<compile_context>
chip_gen: v7x
topology: tpu7x:2x2x1
jax: 0.10.0
libtpu: 0.0.40
codegen_flags: <defaults>
</compile_context>

<pallas_src>
import jax
import jax.numpy as jnp
from jax.experimental import pallas as pl
from jax.experimental.pallas import tpu as pltpu

HIDDEN = 32        # encoder.config.hidden_size (small synthetic stand-in)
FIT = 128          # fit_size (multiple of 128 -> lane-dense fit_dense output)
NUM_LAYERS = 3     # len(hidden_states) (small synthetic depth)
BATCH = 4          # must be even: head reshapes CLS rows into pairs (-1, 2H)
SEQ = 8
NUM_LABELS = 2
LOGITS_PAD = 128   # pad 2-wide logits to a full 128-lane vreg for dense stores


# ----------------------------- Pallas kernels ------------------------------

def _fused_student_kernel(hs_ref, x2_ref, wf_ref, bf_ref,
                          w1_ref, b1_ref, w2_ref, b2_ref,
                          fit_ref, logits_ref):
    """One grid step = one encoder layer.

    fit_dense:   [N, H] @ [H, F] + b_fit           (full layer block, MXU, f32 acc)
    classifier:  x2 [B2, 2H] -> dense -> tanh -> padded out_proj [B2, 128]

    The head costs a few KFLOPs and is recomputed every step (hidden under the
    fit matmul); this keeps every output block owned by its own grid step, so
    the layer axis can be marked "parallel" (v7x megacore) without a revisited
    output block. Dropout is identity in this deterministic eval forward.
    """
    x = hs_ref[0]                                   # (N, H)
    # NOTE: at real RoBERTa sizes, cast x / wf to bf16 here (keep f32 accumulation).
    fit_ref[0] = (
        jnp.dot(x, wf_ref[...], preferred_element_type=jnp.float32) + bf_ref[...]
    ).astype(fit_ref.dtype)

    h = jnp.tanh(
        jnp.dot(x2_ref[...], w1_ref[...], preferred_element_type=jnp.float32)
        + b1_ref[...]
    )
    logits_ref[0] = (
        jnp.dot(h, w2_ref[...], preferred_element_type=jnp.float32) + b2_ref[...]
    ).astype(logits_ref.dtype)


def fused_student_forward(hs_stacked, x2, w_fit, b_fit,
                          w_dense, b_dense, w_out_pad, b_out_pad):
    """Single pallas_call for the whole student path.

    grid = (num_layers,), one full [B*S, H] block per step; fit weight/bias and
    head params use constant index maps so they stay resident in VMEM.
    """
    L, N, H = hs_stacked.shape
    F = w_fit.shape[1]
    B2, H2 = x2.shape
    P = w_out_pad.shape[1]

    flops = L * (2 * N * H * F + 2 * B2 * H2 * H + 2 * B2 * H * P)
    bytes_accessed = 4 * (
        L * N * H + B2 * H2 + H * F + F + H2 * H + H + H * P + P
        + L * N * F + L * B2 * P
    )

    fitted, logits_p = pl.pallas_call(
        _fused_student_kernel,
        out_shape=(
            jax.ShapeDtypeStruct((L, N, F), jnp.float32),
            jax.ShapeDtypeStruct((L, B2, P), jnp.float32),
        ),
        grid=(L,),
        in_specs=[
            pl.BlockSpec((1, N, H), lambda l: (l, 0, 0)),   # per-layer activations
            pl.BlockSpec((B2, H2), lambda l: (0, 0)),       # CLS pairs (resident)
            pl.BlockSpec((H, F), lambda l: (0, 0)),         # fit_dense W (resident)
            pl.BlockSpec((1, F), lambda l: (0, 0)),         # fit_dense b (resident)
            pl.BlockSpec((H2, H), lambda l: (0, 0)),        # head dense W
            pl.BlockSpec((1, H), lambda l: (0, 0)),         # head dense b
            pl.BlockSpec((H, P), lambda l: (0, 0)),         # head out_proj W (padded)
            pl.BlockSpec((1, P), lambda l: (0, 0)),         # head out_proj b (padded)
        ],
        out_specs=(
            pl.BlockSpec((1, N, F), lambda l: (l, 0, 0)),
            pl.BlockSpec((1, B2, P), lambda l: (l, 0, 0)),
        ),
        compiler_params=pltpu.CompilerParams(
            dimension_semantics=("parallel",),
        ),
        cost_estimate=pl.CostEstimate(
            flops=flops,
            transcendentals=L * B2 * H,
            bytes_accessed=bytes_accessed,
        ),
    )(hs_stacked, x2, w_fit, b_fit, w_dense, b_dense, w_out_pad, b_out_pad)
    return fitted, logits_p


def _head_kernel(x2_ref, w1_ref, b1_ref, w2_ref, b2_ref, out_ref):
    """x2 [B2, 2H] -> dense(2H,H) -> tanh -> padded out_proj(H, 128)."""
    h = jnp.tanh(
        jnp.dot(x2_ref[...], w1_ref[...], preferred_element_type=jnp.float32)
        + b1_ref[...]
    )
    out_ref[...] = (
        jnp.dot(h, w2_ref[...], preferred_element_type=jnp.float32) + b2_ref[...]
    ).astype(out_ref.dtype)


def classifier_head(x2, w1, b1, w2_pad, b2_pad):
    """Grid-less single-block head kernel (non-student path only)."""
    B2 = x2.shape[0]
    P = w2_pad.shape[1]
    return pl.pallas_call(
        _head_kernel,
        out_shape=jax.ShapeDtypeStruct((B2, P), jnp.float32),
    )(x2, w1, b1, w2_pad, b2_pad)


# ------------------------------ Model wrapper -------------------------------

class Model:
    """JAX/Pallas port of the PyTorch `Model` (classifier head + fit_dense)."""

    def __init__(self, key, hidden_size=HIDDEN, fit_size=FIT, num_labels=NUM_LABELS):
        self.num_labels = num_labels
        k1, k2, k3, k4, k5, k6 = jax.random.split(key, 6)
        s = 0.02
        # RobertaClassificationHead.dense: Linear(2H, H)   (stored as [in, out])
        self.w_dense = (jax.random.normal(k1, (2 * hidden_size, hidden_size)) * s).astype(jnp.float32)
        self.b_dense = (jax.random.normal(k2, (1, hidden_size)) * s).astype(jnp.float32)
        # RobertaClassificationHead.out_proj: Linear(H, 2)
        self.w_out = (jax.random.normal(k3, (hidden_size, num_labels)) * s).astype(jnp.float32)
        self.b_out = (jax.random.normal(k4, (1, num_labels)) * s).astype(jnp.float32)
        # Model.fit_dense: Linear(H, fit_size)
        self.w_fit = (jax.random.normal(k5, (hidden_size, fit_size)) * s).astype(jnp.float32)
        self.b_fit = (jax.random.normal(k6, (1, fit_size)) * s).astype(jnp.float32)
        # Lane-padded out_proj params: 2-wide logits are computed into a full
        # 128-lane slab so the kernel's logit store is an unmasked, lane-dense
        # vst. Padded columns are exactly zero and are sliced off in __call__.
        self.w_out_pad = jnp.zeros((hidden_size, LOGITS_PAD), jnp.float32).at[:, :num_labels].set(self.w_out)
        self.b_out_pad = jnp.zeros((1, LOGITS_PAD), jnp.float32).at[:, :num_labels].set(self.b_out)

    def __call__(self, last_hidden_state, hidden_states, mod='train', is_student=False):
        # TODO(synk): the injected HuggingFace `encoder` has no clean Pallas
        # equivalent here; its outputs are supplied as inputs instead.
        B, S, H = last_hidden_state.shape
        assert B % 2 == 0, "classification head pairs CLS rows: batch must be even"
        # classifier glue: features[:, 0, :] -> reshape(-1, 2H)   (plain JAX)
        cls = last_hidden_state[:, 0, :]
        x2 = cls.reshape(-1, 2 * H)

        if is_student:
            L = len(hidden_states)
            hs_stacked = jnp.stack(hidden_states).reshape(L, B * S, H)
            fitted_all, logits_p = fused_student_forward(
                hs_stacked, x2, self.w_fit, self.b_fit,
                self.w_dense, self.b_dense, self.w_out_pad, self.b_out_pad)
            logits = logits_p[0, :, :self.num_labels]
            fitted = tuple(fitted_all[l].reshape(B, S, -1) for l in range(L))
            outputs = {
                'last_hidden_state': last_hidden_state,
                'hidden_states': fitted,
                'logits': logits,
            }
        else:
            logits_p = classifier_head(
                x2, self.w_dense, self.b_dense, self.w_out_pad, self.b_out_pad)
            logits = logits_p[:, :self.num_labels]
            outputs = {
                'last_hidden_state': last_hidden_state,
                'hidden_states': hidden_states,
                'logits': logits,
            }

        if mod == 'train':
            return outputs
        return logits


# ---------------------------- reference (pure JAX) ---------------------------

def _ref_forward(model, last_hidden_state, hidden_states):
    B, S, H = last_hidden_state.shape
    cls = last_hidden_state[:, 0, :].reshape(-1, 2 * H)
    h = jnp.tanh(cls @ model.w_dense + model.b_dense)
    logits = h @ model.w_out + model.b_out
    fitted = tuple(
        (layer.reshape(-1, H) @ model.w_fit + model.b_fit).reshape(B, S, -1)
        for layer in hidden_states
    )
    return logits, fitted


# ----------------------------------- main ------------------------------------

if __name__ == "__main__":
    key = jax.random.PRNGKey(0)
    k_model, k_lhs, k_hs = jax.random.split(key, 3)

    model = Model(k_model)

    # Deterministic synthetic encoder outputs (the encoder itself is external).
    last_hidden_state = jax.random.normal(k_lhs, (BATCH, SEQ, HIDDEN), jnp.float32)
    hs_keys = jax.random.split(k_hs, NUM_LAYERS)
    hidden_states = tuple(
        jax.random.normal(hk, (BATCH, SEQ, HIDDEN), jnp.float32) for hk in hs_keys
    )

    # student + train path: one fused pallas_call (head + all fit_dense layers)
    outputs = model(last_hidden_state, hidden_states, mod='train', is_student=True)
    logits = jax.block_until_ready(outputs['logits'])
    fitted = [jax.block_until_ready(h) for h in outputs['hidden_states']]

    # eval path (non-student): single grid-less head kernel, returns only logits
    eval_logits = jax.block_until_ready(
        model(last_hidden_state, hidden_states, mod='eval', is_student=False)
    )

    # correctness check against pure-JAX reference
    ref_logits, ref_fitted = _ref_forward(model, last_hidden_state, hidden_states)
    assert jnp.allclose(logits, ref_logits, atol=1e-5, rtol=1e-5)
    assert jnp.allclose(eval_logits, ref_logits, atol=1e-5, rtol=1e-5)
    for got, want in zip(fitted, ref_fitted):
        assert jnp.allclose(got, want, atol=1e-5, rtol=1e-5)
    assert logits.shape == (BATCH // 2, NUM_LABELS)
    assert fitted[0].shape == (BATCH, SEQ, FIT)

    print("KERNEL_OK")
</pallas_src>

<mosaic_0001>
module attributes {stable_mosaic.version = 11 : i64} {
  func.func @_fused_student_kernel(%arg0: i32, %arg1: memref<1x32x32xf32, #tpu.memory_space<vmem>>, %arg2: memref<2x64xf32, #tpu.memory_space<vmem>>, %arg3: memref<32x128xf32, #tpu.memory_space<vmem>>, %arg4: memref<1x128xf32, #tpu.memory_space<vmem>>, %arg5: memref<64x32xf32, #tpu.memory_space<vmem>>, %arg6: memref<1x32xf32, #tpu.memory_space<vmem>>, %arg7: memref<32x128xf32, #tpu.memory_space<vmem>>, %arg8: memref<1x128xf32, #tpu.memory_space<vmem>>, %arg9: memref<1x32x128xf32, #tpu.memory_space<vmem>>, %arg10: memref<1x2x128xf32, #tpu.memory_space<vmem>>) attributes {dimension_semantics = [#tpu.dimension_semantics<parallel>], iteration_bounds = array<i64: 3>, scalar_prefetch = 0 : i64, scratch_operands = 0 : i64, tpu.core_type = #tpu.core_type<tc>, window_params = [{transform_indices = @transform_0, window_bounds = array<i64: 1, 32, 32>}, {pipeline_mode = #tpu.pipeline_mode<synchronous>, transform_indices = @transform_1, window_bounds = array<i64: 2, 64>}, {pipeline_mode = #tpu.pipeline_mode<synchronous>, transform_indices = @transform_2, window_bounds = array<i64: 32, 128>}, {pipeline_mode = #tpu.pipeline_mode<synchronous>, transform_indices = @transform_3, window_bounds = array<i64: 1, 128>}, {pipeline_mode = #tpu.pipeline_mode<synchronous>, transform_indices = @transform_4, window_bounds = array<i64: 64, 32>}, {pipeline_mode = #tpu.pipeline_mode<synchronous>, transform_indices = @transform_5, window_bounds = array<i64: 1, 32>}, {pipeline_mode = #tpu.pipeline_mode<synchronous>, transform_indices = @transform_6, window_bounds = array<i64: 32, 128>}, {pipeline_mode = #tpu.pipeline_mode<synchronous>, transform_indices = @transform_7, window_bounds = array<i64: 1, 128>}, {transform_indices = @transform_8, window_bounds = array<i64: 1, 32, 128>}, {transform_indices = @transform_9, window_bounds = array<i64: 1, 2, 128>}]} {
    %c0 = arith.constant 0 : index
    %c0_0 = arith.constant 0 : index
    %c0_1 = arith.constant 0 : index
    %0 = vector.load %arg1[%c0, %c0_0, %c0_1] : memref<1x32x32xf32, #tpu.memory_space<vmem>>, vector<1x32x32xf32>
    %1 = vector.shape_cast %0 : vector<1x32x32xf32> to vector<32x32xf32>
    %c0_2 = arith.constant 0 : index
    %c0_3 = arith.constant 0 : index
    %2 = vector.load %arg3[%c0_2, %c0_3] : memref<32x128xf32, #tpu.memory_space<vmem>>, vector<32x128xf32>
    %cst = arith.constant dense<0.000000e+00> : vector<32x128xf32>
    %3 = tpu.matmul %1, %2, %cst {dimension_numbers = #tpu.dot_dimension_numbers<[1], [0], [0], [1], [0, 0, 1, 1], [], []>} : vector<32x32xf32>, vector<32x128xf32>, vector<32x128xf32> -> vector<32x128xf32>
    %c0_4 = arith.constant 0 : index
    %c0_5 = arith.constant 0 : index
    %4 = vector.load %arg4[%c0_4, %c0_5] : memref<1x128xf32, #tpu.memory_space<vmem>>, vector<1x128xf32>
    %5 = vector.broadcast %4 : vector<1x128xf32> to vector<32x128xf32>
    %6 = arith.addf %3, %5 : vector<32x128xf32>
    %c0_6 = arith.constant 0 : index
    %c0_7 = arith.constant 0 : index
    %c0_8 = arith.constant 0 : index
    %7 = vector.load %arg9[%c0_6, %c0_7, %c0_8] : memref<1x32x128xf32, #tpu.memory_space<vmem>>, vector<1x32x128xf32>
    %8 = vector.shape_cast %7 : vector<1x32x128xf32> to vector<32x128xf32>
    %9 = vector.shape_cast %6 : vector<32x128xf32> to vector<1x32x128xf32>
    tpu.vector_store %arg9[%c0_6, %c0_7, %c0_8], %9 {strides = array<i32>} : memref<1x32x128xf32, #tpu.memory_space<vmem>>, vector<1x32x128xf32>,
    %c0_9 = arith.constant 0 : index
    %c0_10 = arith.constant 0 : index
    %10 = vector.load %arg2[%c0_9, %c0_10] : memref<2x64xf32, #tpu.memory_space<vmem>>, vector<2x64xf32>
    %c0_11 = arith.constant 0 : index
    %c0_12 = arith.constant 0 : index
    %11 = vector.load %arg5[%c0_11, %c0_12] : memref<64x32xf32, #tpu.memory_space<vmem>>, vector<64x32xf32>
    %cst_13 = arith.constant dense<0.000000e+00> : vector<2x32xf32>
    %12 = tpu.matmul %10, %11, %cst_13 {dimension_numbers = #tpu.dot_dimension_numbers<[1], [0], [0], [1], [0, 0, 1, 1], [], []>} : vector<2x64xf32>, vector<64x32xf32>, vector<2x32xf32> -> vector<2x32xf32>
    %c0_14 = arith.constant 0 : index
    %c0_15 = arith.constant 0 : index
    %13 = vector.load %arg6[%c0_14, %c0_15] : memref<1x32xf32, #tpu.memory_space<vmem>>, vector<1x32xf32>
    %14 = vector.broadcast %13 : vector<1x32xf32> to vector<2x32xf32>
    %15 = arith.addf %12, %14 : vector<2x32xf32>
    %16 = math.tanh %15 : vector<2x32xf32>
    %c0_16 = arith.constant 0 : index
    %c0_17 = arith.constant 0 : index
    %17 = vector.load %arg7[%c0_16, %c0_17] : memref<32x128xf32, #tpu.memory_space<vmem>>, vector<32x128xf32>
    %cst_18 = arith.constant dense<0.000000e+00> : vector<2x128xf32>
    %18 = tpu.matmul %16, %17, %cst_18 {dimension_numbers = #tpu.dot_dimension_numbers<[1], [0], [0], [1], [0, 0, 1, 1], [], []>} : vector<2x32xf32>, vector<32x128xf32>, vector<2x128xf32> -> vector<2x128xf32>
    %c0_19 = arith.constant 0 : index
    %c0_20 = arith.constant 0 : index
    %19 = vector.load %arg8[%c0_19, %c0_20] : memref<1x128xf32, #tpu.memory_space<vmem>>, vector<1x128xf32>
    %20 = vector.broadcast %19 : vector<1x128xf32> to vector<2x128xf32>
    %21 = arith.addf %18, %20 : vector<2x128xf32>
    %c0_21 = arith.constant 0 : index
    %c0_22 = arith.constant 0 : index
    %c0_23 = arith.constant 0 : index
    %22 = vector.load %arg10[%c0_21, %c0_22, %c0_23] : memref<1x2x128xf32, #tpu.memory_space<vmem>>, vector<1x2x128xf32>
    %23 = vector.shape_cast %22 : vector<1x2x128xf32> to vector<2x128xf32>
    %24 = vector.shape_cast %21 : vector<2x128xf32> to vector<1x2x128xf32>
    tpu.vector_store %arg10[%c0_21, %c0_22, %c0_23], %24 {strides = array<i32>} : memref<1x2x128xf32, #tpu.memory_space<vmem>>, vector<1x2x128xf32>,
    return
  }
  func.func @transform_0(%arg0: i32) -> (i32, i32, i32) {
    %c0_i32 = arith.constant 0 : i32
    %c0_i32_0 = arith.constant 0 : i32
    %c0_i32_1 = arith.constant 0 : i32
    return %arg0, %c0_i32, %c0_i32_0 : i32, i32, i32
  }
  func.func @transform_1(%arg0: i32) -> (i32, i32) {
    %c0_i32 = arith.constant 0 : i32
    %c0_i32_0 = arith.constant 0 : i32
    %c0_i32_1 = arith.constant 0 : i32
    return %c0_i32, %c0_i32_0 : i32, i32
  }
  func.func @transform_2(%arg0: i32) -> (i32, i32) {
    %c0_i32 = arith.constant 0 : i32
    %c0_i32_0 = arith.constant 0 : i32
    %c0_i32_1 = arith.constant 0 : i32
    return %c0_i32, %c0_i32_0 : i32, i32
  }
  func.func @transform_3(%arg0: i32) -> (i32, i32) {
    %c0_i32 = arith.constant 0 : i32
    %c0_i32_0 = arith.constant 0 : i32
    %c0_i32_1 = arith.constant 0 : i32
    return %c0_i32, %c0_i32_0 : i32, i32
  }
  func.func @transform_4(%arg0: i32) -> (i32, i32) {
    %c0_i32 = arith.constant 0 : i32
    %c0_i32_0 = arith.constant 0 : i32
    %c0_i32_1 = arith.constant 0 : i32
    return %c0_i32, %c0_i32_0 : i32, i32
  }
  func.func @transform_5(%arg0: i32) -> (i32, i32) {
    %c0_i32 = arith.constant 0 : i32
    %c0_i32_0 = arith.constant 0 : i32
    %c0_i32_1 = arith.constant 0 : i32
    return %c0_i32, %c0_i32_0 : i32, i32
  }
  func.func @transform_6(%arg0: i32) -> (i32, i32) {
    %c0_i32 = arith.constant 0 : i32
    %c0_i32_0 = arith.constant 0 : i32
    %c0_i32_1 = arith.constant 0 : i32
    return %c0_i32, %c0_i32_0 : i32, i32
  }
  func.func @transform_7(%arg0: i32) -> (i32, i32) {
    %c0_i32 = arith.constant 0 : i32
    %c0_i32_0 = arith.constant 0 : i32
    %c0_i32_1 = arith.constant 0 : i32
    return %c0_i32, %c0_i32_0 : i32, i32
  }
  func.func @transform_8(%arg0: i32) -> (i32, i32, i32) {
    %c0_i32 = arith.constant 0 : i32
    %c0_i32_0 = arith.constant 0 : i32
    %c0_i32_1 = arith.constant 0 : i32
    return %arg0, %c0_i32, %c0_i32_0 : i32, i32, i32
  }
  func.func @transform_9(%arg0: i32) -> (i32, i32, i32) {
    %c0_i32 = arith.constant 0 : i32
    %c0_i32_0 = arith.constant 0 : i32
    %c0_i32_1 = arith.constant 0 : i32
    return %arg0, %c0_i32, %c0_i32_0 : i32, i32, i32
  }
}

</mosaic_0001>

<bundles_post_ra>
// kernel: tpu_custom_call.1
= control target key start
LH: loop header
LB: loop body
LE: loop exit
PB: predicated region body
PF: predicated region fallthrough
CT: control target
= control target key end

     0   :  { %15 = vsyncpa [#allocation3], 0  ;;  %s1482_s0 = inlined_call_operand.vmem [shape: f32[3,32,32], index: 0, kind: input, shape index: {}]   ;;  %s1483_s1 = inlined_call_operand.vmem [shape: f32[2,64], index: 1, kind: input, shape index: {}]   ;;  %s1484_s2 = inlined_call_operand.hbm [shape: f32[32,128], index: 2, kind: input, shape index: {}]   ;;  %s1485_s3 = inlined_call_operand.vmem [shape: f32[1,128], index: 3, kind: input, shape index: {}]   ;;  %s1486_s4 = inlined_call_operand.vmem [shape: f32[64,32], index: 4, kind: input, shape index: {}]   ;;  %s1487_s5 = inlined_call_operand.vmem [shape: f32[1,32], index: 5, kind: input, shape index: {}]   ;;  %s1488_s6 = inlined_call_operand.hbm [shape: f32[32,128], index: 6, kind: input, shape index: {}]   ;;  %s1489_s7 = inlined_call_operand.vmem [shape: f32[1,128], index: 7, kind: input, shape index: {}]   ;;  %s1490_s8 = inlined_call_operand.hbm [shape: f32[3,32,128], index: 8, kind: output, shape index: {0}]   ;;  %s1491_s9 = inlined_call_operand.hbm [shape: f32[3,2,128], index: 9, kind: output, shape index: {1}]  }
   0x1   :  { %16 = vsyncpa [#allocation6], 0 }
   0x2   :  { %17 = vsyncpa [#allocation4], 0 }
   0x3   :  { %19 = vsyncpa [#allocation4 + $0x1], 0 }
   0x4   :  { %20 = vsyncpa [#allocation9], 0 }
   0x5   :  { %22 = vsyncpa [#allocation9 + $0x1], 0  ;;  %s1230_s30 = smov 0   ;;  %s1232_s10 = smov 0  }
   0x6   :  { %s1234_s11 = smov 0   ;;  %s1236_s12 = smov 0  }
   0x7 LB: > { %1498 = sst [smem:[#allocation14_spill]] %s1163_s11  ;;  %s1251_s13 = sadd.s32 4294967295, %s1167_s12   ;;  %s1167_s12 = sphi %s1236_s12, %s1512_s12   ;;  %s1163_s11 = sphi %s1234_s11, %s1514_s11   ;;  %s1159_s10 = sphi %s1232_s10, %s1516_s10   ;;  %s1155_s30 = sphi %s1230_s30, %s1515_s30  }
   0x8   : > { %s813_s14 = sadd.s32 4294967294, %s1167_s12   ;;  %s1255_s15 = sadd.s32 1, %s1167_s12  }
   0x9   : > { %1499 = sst [smem:[#allocation15_spill]] %s1255_s15  ;;  %s208_s16 = sadd.s32 1, %s1163_s11 }
   0xa   : > { %s205_s17 = ssub.s32 %s1167_s12, %s1255_s15  ;;  %p218_p0 = scmp.ne.s32.totalorder %s1163_s11, %s1159_s10 }
   0xb   : > { %p206_p1 = scmp.eq.s32.totalorder %s205_s17, 0  ;;  %p219_p2 = scmp.eq.s32.totalorder %s1251_s13, 2 }
   0xc   : > { %p224_p3 = scmp.ne.s32.totalorder %s1159_s10, %s1155_s30  ;;  %p225_p4 = scmp.eq.s32.totalorder %s813_s14, 2 }
   0xd   : > { %s1266_s18 = scalar_select %p206_p1, %s1163_s11, %s208_s16  }
   0xe   : > { %p1268_p5 = por %p219_p2, %p218_p0  ;;  %p1272_p6 = por %p225_p4, %p224_p3 }
   0xf   : > { %1500 = sst [smem:[#allocation16_spill]] %s1266_s18  ;;  %p814_p7 = scmp.ge.s32.totalorder %s1167_s12, 1 }
  0x10   : > { %s1501_s19 = scalar_select %p1268_p5, 1, 0 }
  0x11   : > { %s1502_s20 = scalar_select %p1272_p6, 1, 0 }
  0x12   : > { %p258_p8 = scmp.lt.s32.totalorder %s1167_s12, 4  ;;  %p1492_p9 = scmp.eq.s32.totalorder %s1251_s13, 0 }
  0x13   : > { %s1169_s22 = smov [#allocation2]   ;;  %s1170_s25 = smov [#allocation5]  }
  0x14   : > { %p1279_p10 = pnand %p814_p7, %p258_p8  ;;  %s273_s23 = sshll.u32 %s1169_s22, 4  ;;  %s274_s23 = int_to_ptr.vmem [resolvable:$true] %s273_s23 }
  0x15   : > { %s295_s26 = sshll.u32 %s1170_s25, 4  ;;  %s1009_s29 = scalar_lea.hbm %s1484_s2, 512  ;;  %s1291_s26 = int_to_ptr.vmem [resolvable:$true] %s295_s26 }
  0x16   : > { %s1503_s21 = scalar_select %p1279_p10, 1, 0 }
  0x17   : > { %p947_p11 = pneg %p1279_p10  ;;  %p1010_p13 = scmp.ne.s32.totalorder %s1484_s2, %s1009_s29 }
  0x18   : > { %p1016_p3 = scmp.lt.u32.totalorder %s1009_s29, %s1484_s2 }
  0x19   : > { %p1287_p12 = pnand %p1492_p9, %p947_p11 }
  0x1b   : > { %p1011_p0 = pneg %p1287_p12 }
  0x1d   : > { %p1012_p1 = pnand %p1011_p0, %p1010_p13 }
  0x1f   : > { %p1013_p2 = pneg %p1012_p1 }
  0x21   : > { %p1018_p4 = pnand %p1016_p3, %p1013_p2 }
  0x23   : > { %1021 = shalt.err (!%p1018_p4)
}
  0x24   : > { %s1022_s25 = scalar_lea.vmem %s274_s23, 512  ;;  %p1030_p9 = scmp.lt.s32.totalorder %s274_s23, %s274_s23 }
  0x25   : > { %p1023_p7 = scmp.ne.s32.totalorder %s274_s23, %s1022_s25  ;;  %p1031_p6 = scmp.lt.s32.totalorder %s1022_s25, %s1022_s25 }
  0x27   : > { %p1025_p8 = pnand %p1023_p7, %p1011_p0  ;;  %p1032_p5 = por %p1031_p6, %p1030_p9 }
  0x29   : > { %p1026_p11 = pneg %p1025_p8 }
  0x2b   : > { %p1033_p10 = pnand %p1032_p5, %p1026_p11 }
  0x2d   : > { %1036 = shalt.err (!%p1033_p10)
}
  0x2e   : > { %s1171_s27 = smov 128   ;;  %s1172_s28 = smov 8  }
  0x2f   : > { %950 = dma.hbm_to_vmem [thread:$0]  (!%p1287_p12), %s1484_s2, 512, %s274_s23, [#allocation3], %s1171_s27, %s1171_s27, %s1172_s28  }
  0x30   : > { %s1037_s22 = scalar_lea.hbm %s1488_s6, 512 }
  0x31   : > { %p1038_p13 = scmp.ne.s32.totalorder %s1488_s6, %s1037_s22  ;;  %p1044_p9 = scmp.lt.u32.totalorder %s1037_s22, %s1488_s6 }
  0x33   : > { %p1040_p5 = pnand %p1038_p13, %p1011_p0 }
  0x35   : > { %p1041_p6 = pneg %p1040_p5 }
  0x37   : > { %p1046_p10 = pnand %p1044_p9, %p1041_p6 }
  0x39   : > { %1049 = shalt.err (!%p1046_p10)
}
  0x3a   : > { %s1050_s23 = scalar_lea.vmem %s1291_s26, 512  ;;  %p1058_p4 = scmp.lt.s32.totalorder %s1291_s26, %s1291_s26 }
  0x3b   : > { %p1051_p1 = scmp.ne.s32.totalorder %s1291_s26, %s1050_s23  ;;  %p1059_p7 = scmp.lt.s32.totalorder %s1050_s23, %s1050_s23 }
  0x3d   : > { %p1053_p2 = pnand %p1051_p1, %p1011_p0  ;;  %p1060_p8 = por %p1059_p7, %p1058_p4 }
  0x3f   : > { %p1054_p3 = pneg %p1053_p2 }
  0x41   : > { %p1061_p11 = pnand %p1060_p8, %p1054_p3 }
  0x43   : > { %1064 = shalt.err (!%p1061_p11)
}
  0x44   : > { %953 = dma.hbm_to_vmem [thread:$0]  (!%p1287_p12), %s1488_s6, 512, %s1291_s26, [#allocation6], %s1171_s27, %s1171_s27, %s1172_s28  }
  0x45   : > { %p1505_p13 = scmp.ne.s32.totalorder %s1503_s21, 0 }
  0x46   : > { %p1506_p5 = scmp.eq.s32.totalorder (!%p1505_p13), %s1251_s13, 0 }
  0x47   : > { %322 = sbr.rel (%p1505_p13) target bundleno = 555 (0x22b), region = 52 }
  0x4e   : > { %1138 = dma.done.wait (%p1506_p5), [#allocation3], 512   ;;  %p1507_p0 = pmov %p1506_p5 }
  0x50   : > { %1140 = vsyncadd (%p1507_p0), [#allocation3], 4294966784  ;;  %p1508_p6 = pmov %p1507_p0 }
  0x51   : > { %p1509_p9 = pmov %p1507_p0 }
  0x52   : > { %1142 = dma.done.wait (%p1508_p6), [#allocation6], 512  }
  0x53   : > { %1144 = vsyncadd (%p1509_p9), [#allocation6], 4294966784  ;;  %v1173_v0 = vmov 0.0|0.0   ;;  %vm1174_vm0 = vmmov 0   ;;  %v1175_v1 = vmov 0.0   ;;  %v490_v2 = vld [vmem:[%s1486_s4] sm:$0xff] }
  0x54   : > { %917 = vmatprep.subr.bf16.mxu1 %v1173_v0  ;;  %895 = vmatprep.mubr.msk.f32.mxu1 %vm1174_vm0, %v1175_v1  ;;  %v491_v3 = vld [vmem:[%s1486_s4 + $0x8] sm:$0xff]  ;;  %v492_v4 = vld [vmem:[%s1486_s4 + $0x10] sm:$0xff]  ;;  %v493_v6 = vld [vmem:[%s1486_s4 + $0x18] sm:$0xff]  ;;  %vm505_vm1 = vcmask 523264   ;;  %p367_p12 = scmp.lt.s32.totalorder %s1251_s13, 2  ;;  %vm387_vm2 = vcmask 261120  }
  0x55   : > { %v918_v5 = vpack.c.bf16 %v491_v3, %v490_v2  ;;  %v921_v7 = vpack.c.bf16 %v493_v6, %v492_v4  ;;  %v376_v8 = vld [vmem:[#allocation2] sm:$0xff]  ;;  %v377_v9 = vld [vmem:[#allocation2 + $0x8] sm:$0xff]  ;;  %v496_v14 = vld [vmem:[%s1486_s4 + $0x30] sm:$0xff]  ;;  %s1393_s22 = sand.u32 1, %s1159_s10   ;;  %s842_s21 = sshll.u32 %s1251_s13, 9 }
  0x56   : > { %v494_v10 = vld [vmem:[%s1486_s4 + $0x20] sm:$0xff]  ;;  %v495_v11 = vld [vmem:[%s1486_s4 + $0x28] sm:$0xff]  ;;  %v909_v12 = vpack.c.bf16 %v377_v9, %v376_v8  ;;  %v497_v15 = vld [vmem:[%s1486_s4 + $0x38] sm:$0xff]  ;;  %s368_s26 = scalar_select %p367_p12, %s1251_s13, 2 }
  0x57   : > { %919 = vmatpush3.bf16.msra.mxu1 %v918_v5  ;;  %v924_v13 = vpack.c.bf16 %v495_v11, %v494_v10  ;;  %v927_v16 = vpack.c.bf16 %v497_v15, %v496_v14  ;;  %v489_v17 = vld [vmem:[%s1483_s1] sm:$0x3]  ;;  %v378_v18 = vld [vmem:[#allocation2 + $0x10] sm:$0xff]  ;;  %v379_v19 = vld [vmem:[#allocation2 + $0x18] sm:$0xff]  ;;  %s821_s25 = sshll.u32 %s1393_s22, 5  ;;  %s666_s28 = scalar_lea.sflag [#allocation4], %s1393_s22 }
  0x58   : > { %920 = vmatprep.subr.bf16.mxu1 %v1173_v0  ;;  %910 = vmatprep.subr.bf16.mxu0 %v909_v12  ;;  %v913_v20 = vpack.c.bf16 %v379_v19, %v378_v18  ;;  %s841_s27 = sshll.u32 %s368_s26, 5  ;;  %v580_v23 = vld [vmem:[#allocation5] sm:$0xff]  ;;  %v581_v24 = vld [vmem:[#allocation5 + $0x8] sm:$0xff]  ;;  %v582_v27 = vld [vmem:[#allocation5 + $0x10] sm:$0xff]  ;;  %s359_s15 = scalar_lea.vmem [#allocation7], %s821_s25 }
  0x59   : > { %912 = vmatpush3.bf16.msra.mxu0 %v909_v12  ;;  %s371_s14 = scalar_lea.vmem %s1482_s0, %s841_s27  ;;  %v930_v26 = vpack.c.bf16 %v581_v24, %v580_v23  ;;  %v583_v28 = vld [vmem:[#allocation5 + $0x18] sm:$0xff]  ;;  %v830_v31 = vld [vmem:[%s1487_s5] ss:$0 sm:$0xff]  ;;  %s684_s18 = sshll.u32 %s359_s15, 4  ;;  %s1399_s18 = int_to_ptr.vmem [resolvable:$true] %s684_s18 }
  0x5a   : > { %914 = vmatprep.subr.bf16.mxu0 %v913_v20  ;;  %v372_v21 = vld [vmem:[%s371_s14] sm:$0xff]  ;;  %v373_v22 = vld [vmem:[%s371_s14 + $0x8] sm:$0xff]  ;;  %v374_v25 = vld [vmem:[%s371_s14 + $0x10] sm:$0xff]  ;;  %v933_v30 = vpack.c.bf16 %v583_v28, %v582_v27  ;;  %s1405_s27 = scalar_lea.hbm %s1490_s8, %s842_s21  ;;  %s1065_s29 = scalar_lea.vmem %s1399_s18, 512 }
  0x5b   : > { %922 = vmatpush3.bf16.msra.mxu1 %v921_v7  ;;  %873 = vmatprep.mubr.msk.f32.mxu0 %vm387_vm2, %v372_v21  ;;  %v375_v29 = vld [vmem:[%s371_s14 + $0x18] sm:$0xff]  ;;  %v825_v36 = vld [vmem:[%s1485_s3] ss:$0 sm:$0xff]  ;;  %p1066_p10 = scmp.ne.s32.totalorder %s1399_s18, %s1065_s29  ;;  %p1510_p1 = scmp.ne.s32.totalorder %s1501_s19, 0 }
  0x5c   : > { %923 = vmatprep.subr.bf16.mxu1 %v1173_v0  ;;  %s1176_s14 = smov [#allocation7]  }
  0x5d   : > { %916 = vmatpush3.bf16.msra.mxu0 %v913_v20  ;;  %p1067_p2 = pnand %p1066_p10, %p1510_p1  ;;  %s1069_s16 = sshll.u32 %s1176_s14, 4  ;;  %s1070_s16 = int_to_ptr.vmem [resolvable:$false] %s1069_s16 }
  0x5e   : > { %929 = vmatprep.subr.bf16.mxu0 %v1173_v0  ;;  %s1071_s17 = scalar_lea.vmem %s1070_s16, 1024  ;;  %p1072_p4 = scmp.lt.s32.totalorder %s1399_s18, %s1070_s16 }
  0x5f   : > { %925 = vmatpush3.bf16.msra.mxu1 %v924_v13  ;;  %p1068_p3 = pneg %p1067_p2  ;;  %p1073_p7 = scmp.lt.s32.totalorder %s1071_s17, %s1065_s29 }
  0x60   : > { %926 = vmatprep.subr.bf16.mxu1 %v1173_v0  ;;  %874 = vmatmul.mubr.msk.f32.vlgmr.msra.gmra.mrb[0].mxu0 %vm387_vm2, %v373_v22 }
  0x61   : > { %876 = vmatprep.mubr.msk.f32.mxu0 %vm387_vm2, %v374_v25  ;;  %931 = vmatpush3.bf16.msra.mxu0 %v930_v26  ;;  %p1074_p8 = por %p1073_p7, %p1072_p4 }
  0x62   : > { %932 = vmatprep.subr.bf16.mxu0 %v1173_v0 }
  0x63   : > { %928 = vmatpush3.bf16.msra.mxu1 %v927_v16  ;;  %p1075_p11 = pnand %p1074_p8, %p1068_p3 }
  0x64   : > { %877 = vmatmul.mubr.msk.f32.gmra.mrb[2].mxu0 %vm387_vm2, %v375_v29 }
  0x65   : > { %906 = vmatprep.mubr.msk.f32.mxu0 %vm1174_vm0, %v1175_v1  ;;  %934 = vmatpush3.bf16.msra.mxu0 %v933_v30 }
  0x66   : > { %896 = vmatmul.mubr.msk.f32.vlgmr.msra.gmra.mrb[0].mxu1 %vm505_vm1, %v489_v17 }
 0x133   : > { %v875_v37 = vpop.f32.mrb[0].mxu0 }
 0x134   : > { %v472_v38 = vadd.f32 %v875_v37, %v825_v36  ;;  %v466_v39 = vpop.f32.mrb[1].mxu0 }
 0x135   : > { %v467_v40 = vadd.f32 %v825_v36, %v466_v39 }
 0x136   : > { %486 = vst [vmem:[%s359_s15 + $0x8] sm:$0xff] %v472_v38 }
 0x137   : > { %485 = vst [vmem:[%s359_s15] sm:$0xff] %v467_v40  ;;  %v878_v41 = vpop.f32.mrb[2].mxu0 }
 0x138   : > { %v482_v42 = vadd.f32 %v878_v41, %v825_v36  ;;  %v476_v43 = vpop.f32.mrb[3].mxu0 }
 0x139   : > { %v575_v32 = vpop.f32.mrb[0].mxu1  ;;  %v477_v44 = vadd.f32 %v825_v36, %v476_v43 }
 0x13a   : > { %v576_v33 = vadd.f32 %v830_v31, %v575_v32  ;;  %v897_v34 = vpop.f32.mrb[1].mxu1  ;;  %488 = vst [vmem:[%s359_s15 + $0x18] sm:$0xff] %v482_v42 }
 0x13b   : > { %487 = vst [vmem:[%s359_s15 + $0x10] sm:$0xff] %v477_v44 }
 0x13c   : > { %1007 = vtanh.f32 %v576_v33 }
 0x146   : > { %v1008_v35 = vpop.eup %1007 }
 0x147   : > { %907 = vmatmul.mubr.msk.f32.vlgmr.msra.gmra.mrb[4].mxu0 %vm387_vm2, %v1008_v35 }
 0x148   : > { %1078 = shalt.err (!%p1075_p11)
}
 0x149   : > { %s1079_s25 = scalar_lea.hbm %s1405_s27, 512  ;;  %s1083_s15 = scalar_lea.hbm %s1490_s8, 1536 }
 0x14a   : > { %p1080_p13 = scmp.ne.s32.totalorder %s1405_s27, %s1079_s25  ;;  %p1084_p6 = scmp.lt.u32.totalorder %s1405_s27, %s1490_s8 }
 0x14b   : > { %p1085_p9 = scmp.lt.u32.totalorder %s1083_s15, %s1079_s25  ;;  %p1087_p10 = scmp.lt.u32.totalorder %s1079_s25, %s1405_s27 }
 0x14c   : > { %p1081_p5 = pnand %p1080_p13, %p1510_p1 }
 0x14d   : > { %p1086_p12 = por %p1085_p9, %p1084_p6 }
 0x14e   : > { %p1082_p0 = pneg %p1081_p5 }
 0x14f   : > { %p1088_p2 = por %p1087_p10, %p1086_p12 }
 0x151   : > { %p1089_p3 = pnand %p1088_p2, %p1082_p0 }
 0x153   : > { %1092 = shalt.err (!%p1089_p3)
}
 0x154   : > { %s1177_s26 = smov 128   ;;  %s1178_s29 = smov 8   ;;  %v832_v45 = vld [vmem:[%s1489_s7] ss:$0 sm:$0xff] }
 0x155   : > { %943 = dma.vmem_to_hbm [thread:$0]  (%p1510_p1), %s1399_s18, 512, %s1405_s27, %s666_s28, %s1177_s26, %s1177_s26, %s1178_s29  }
 0x156   : > { %s822_s14 = sshll.u32 %s1393_s22, 1  ;;  %s838_s25 = sshll.u32 %s1251_s13, 5 }
 0x157   : > { %s366_s23 = scalar_lea.vmem [#allocation8], %s822_s14  ;;  %s1439_s24 = scalar_lea.hbm %s1491_s9, %s838_s25 }
 0x158   : > { %s700_s11 = sshll.u32 %s366_s23, 4  ;;  %s671_s18 = scalar_lea.sflag [#allocation9], %s1393_s22  ;;  %s1441_s11 = int_to_ptr.vmem [resolvable:$true] %s700_s11 }
 0x159   : > { %s1093_s27 = scalar_lea.vmem %s1441_s11, 32  ;;  %s1179_s13 = smov [#allocation8]  }
 0x15a   : > { %p1094_p4 = scmp.ne.s32.totalorder %s1441_s11, %s1093_s27  ;;  %s1097_s28 = sshll.u32 %s1179_s13, 4  ;;  %s1098_s28 = int_to_ptr.vmem [resolvable:$false] %s1097_s28 }
 0x15b   : > { %s1099_s26 = scalar_lea.vmem %s1098_s28, 64  ;;  %p1100_p11 = scmp.lt.s32.totalorder %s1441_s11, %s1098_s28 }
 0x15c   : > { %p1095_p7 = pnand %p1094_p4, %p1510_p1  ;;  %p1101_p13 = scmp.lt.s32.totalorder %s1099_s26, %s1093_s27 }
 0x15e   : > { %p1096_p8 = pneg %p1095_p7  ;;  %p1102_p5 = por %p1101_p13, %p1100_p11 }
 0x160   : > { %p1103_p0 = pnand %p1102_p5, %p1096_p8 }
 0x21a   : > { %v660_v46 = vpop.f32.mrb[4].mxu0 }
 0x21b   : > { %v661_v47 = vadd.f32 %v832_v45, %v660_v46  ;;  %v908_v48 = vpop.f32.mrb[5].mxu0 }
 0x21d   : > { %664 = vst [vmem:[%s366_s23] sm:$0x3] %v661_v47 }
 0x21e   : > { %1106 = shalt.err (!%p1103_p0)
}
 0x21f   : > { %s1107_s22 = scalar_lea.hbm %s1439_s24, 32  ;;  %s1111_s16 = scalar_lea.hbm %s1491_s9, 96 }
 0x220   : > { %p1108_p6 = scmp.ne.s32.totalorder %s1439_s24, %s1107_s22  ;;  %p1112_p10 = scmp.lt.u32.totalorder %s1439_s24, %s1491_s9 }
 0x221   : > { %p1113_p2 = scmp.lt.u32.totalorder %s1111_s16, %s1107_s22  ;;  %p1115_p4 = scmp.lt.u32.totalorder %s1107_s22, %s1439_s24 }
 0x222   : > { %p1109_p9 = pnand %p1108_p6, %p1510_p1 }
 0x223   : > { %p1114_p3 = por %p1113_p2, %p1112_p10 }
 0x224   : > { %p1110_p12 = pneg %p1109_p9 }
 0x225   : > { %p1116_p7 = por %p1115_p4, %p1114_p3 }
 0x227   : > { %p1117_p8 = pnand %p1116_p7, %p1110_p12 }
 0x229   : > { %1120 = shalt.err (!%p1117_p8)
}
 0x22a   : > { %944 = dma.vmem_to_hbm [thread:$0]  (%p1510_p1), %s1441_s11, 32, %s1439_s24, %s671_s18  }
 0x22b PF: > { %p965_p11 = scmp.ge.s32.totalorder %s1167_s12, 2  ;;  %s712_s23 = sand.u32 1, %s1155_s30  }
 0x22c   : > { %p1511_p13 = scmp.ne.s32.totalorder %s1502_s20, 0  ;;  %s713_s15 = scalar_lea.sflag [#allocation4], %s712_s23 }
 0x22e   : > { %p955_p5 = pnand %p965_p11, %p1511_p13 }
 0x230   : > { %1146 = dma.done.wait (!%p955_p5), %s713_s15, 512  }
 0x231   : > { %1148 = vsyncadd (!%p955_p5), %s713_s15, 4294966784  ;;  %s722_s21 = scalar_lea.sflag [#allocation9], %s712_s23 }
 0x232   : > { %1150 = dma.done.wait (!%p955_p5), %s722_s21, 32  }
 0x233   : > { %1152 = vsyncadd (!%p955_p5), %s722_s21, 4294967264  ;;  %s1512_s12 = sld [smem:[#allocation15_spill]]  ;;  %s1513_s19 = sld [smem:[#allocation14_spill]] }
 0x234   : > { %s1514_s11 = sld [smem:[#allocation16_spill]]  ;;  %s1515_s30 = smov %s1159_s10 }
 0x239   : > { %p25_p1 = scmp.ge.s32.totalorder %s1512_s12, 5   ;;  %s1516_s10 = smov %s1513_s19 }
 0x23b   :  { %27 = sbr.rel (!%p25_p1) target bundleno = 7 (0x7), region = 113 }
 0x242   :  { %727 = vsyncpa [#allocation3], 1 }
 0x243   :  { %729 = vsyncpa [#allocation3 + $0x1], 1 }
 0x244   :  { %730 = vsyncpa [#allocation6], 1 }
 0x245   :  { %731 = vsyncpa [#allocation4], 1 }
 0x246   :  { %733 = vsyncpa [#allocation4 + $0x1], 1 }
 0x247   :  { %734 = vsyncpa [#allocation9], 1 }
 0x248   :  { %736 = vsyncpa [#allocation9 + $0x1], 1 }

</bundles_post_ra>
